<compile_context>
chip_gen: v7x
topology: tpu7x:2x2x1
jax: 0.10.0
libtpu: 0.0.40
codegen_flags: <defaults>
</compile_context>

<pallas_src>
import functools

import jax
import jax.numpy as jnp
import numpy as np
from jax.experimental import pallas as pl
from jax.experimental.pallas import tpu as pltpu

EPS = 1e-5
_SUBLANE = 8  # f32 sublane granularity


# ---------------------------------------------------------------------------
# Fused kernel: LayerNorm + 3x3 conv (im2col matmul) + bias + SiLU.
# One invocation processes the whole batch.
#   x_ref   : (B, Cp, HW)   activations, lane-dense (HW on lanes), zero-padded
#                           channels c >= C
#   g_ref   : (Cp, HW)      LayerNorm gamma (zero in padded channels)
#   bln_ref : (Cp, HW)      LayerNorm beta  (zero in padded channels)
#   w_ref   : (O, 9*Cp)     conv weight, tap-major: [o, t*Cp + c], t = kh*3+kw
#   bc_ref  : (O, HW)       conv bias, pre-broadcast across lanes
#   m_ref   : (9, HW)       per-tap validity masks (1.0 valid / 0.0 pad)
#   o_ref   : (B, O, HW)    output, NCHW-flat, lane-dense
# ---------------------------------------------------------------------------
def _fused_myconv_kernel(x_ref, g_ref, bln_ref, w_ref, bc_ref, m_ref, o_ref,
                         *, C_real, shifts, normalize):
    B, C_pad, HW = x_ref.shape

    gamma = g_ref[...].astype(jnp.float32)          # (Cp, HW)
    beta = bln_ref[...].astype(jnp.float32)         # (Cp, HW)
    masks = m_ref[...]                               # (9, HW) f32
    n = float(C_real * HW)                           # LN element count (real C)

    per_sample = []
    for b in range(B):                               # B static -> unrolled
        x = x_ref[b].astype(jnp.float32)             # (Cp, HW)

        # ---- LayerNorm over (C, H, W), one-pass stats ----------------------
        if normalize:
            s = jnp.sum(x)                           # padded channels are 0
            sq = jnp.sum(x * x)
            mean = s / n
            var = sq / n - mean * mean               # biased variance
            inv = jax.lax.rsqrt(var + EPS)
            xn = (x - mean) * inv * gamma + beta     # padded rows stay 0
        else:
            xn = x

        # ---- 9 shifted taps: XLU lane roll + precomputed validity masks ----
        taps = []
        for t in range(9):
            sh = shifts[t]
            if sh == 0:                              # center tap: no shift, all valid
                taps.append(xn)
            else:
                rolled = pltpu.roll(xn, shift=sh, axis=1)
                taps.append(rolled * masks[t:t + 1, :])
        per_sample.append(jnp.concatenate(taps, axis=0))   # (9*Cp, HW)

    # ---- one weights-stationary matmul over the whole batch (N = B*HW) ----
    patches = jnp.concatenate(per_sample, axis=1)           # (9*Cp, B*HW)
    acc = jnp.dot(w_ref[...], patches.astype(w_ref.dtype),
                  preferred_element_type=jnp.float32)       # (O, B*HW), f32

    bias = bc_ref[...].astype(jnp.float32)                  # (O, HW)
    for b in range(B):
        y = acc[:, b * HW:(b + 1) * HW] + bias               # aligned 256-lane slice
        o_ref[b] = (y * jax.nn.sigmoid(y)).astype(o_ref.dtype)   # SiLU


# ---------------------------------------------------------------------------
# MyConv.forward equivalent
# ---------------------------------------------------------------------------
def my_conv_forward(x, params, normalize=True, matmul_dtype=jnp.float32):
    B, C, H, W = x.shape
    HW = H * W
    w = params["conv_w"]                                     # (O, C, 3, 3) OIHW
    O = w.shape[0]
    C_pad = ((C + _SUBLANE - 1) // _SUBLANE) * _SUBLANE      # sublane-aligned C

    # ---- lane-dense, sublane-aligned operand layouts (cheap wrapper-side) --
    x_flat = jnp.pad(x.reshape(B, C, HW), ((0, 0), (0, C_pad - C), (0, 0)))
    gamma = jnp.pad(params["ln_gamma"].reshape(C, HW),
                    ((0, C_pad - C), (0, 0)))                # zero-pad -> LN out 0
    beta = jnp.pad(params["ln_beta"].reshape(C, HW),
                   ((0, C_pad - C), (0, 0)))

    # Tap-major weight matrix over padded channels:
    #   wmat[o, t*C_pad + c] = w[o, c, kh, kw], t = kh*3 + kw (0 for c >= C)
    w_p = jnp.pad(w, ((0, 0), (0, C_pad - C), (0, 0), (0, 0)))
    wmat = w_p.transpose(0, 2, 3, 1).reshape(O, 9 * C_pad).astype(matmul_dtype)

    # Conv bias pre-broadcast to a lane-dense (O, HW) block.
    bias_hw = jnp.broadcast_to(params["conv_b"].reshape(O, 1), (O, HW))
    bias_hw = jnp.asarray(bias_hw, jnp.float32)

    # Trace-time tap metadata (H, W are Python ints): roll shifts + validity
    # masks for the 3x3 / pad=1 stencil.
    pos = np.arange(HW)
    hh, ww = pos // W, pos % W
    masks_np = np.zeros((9, HW), np.float32)
    shifts = []
    for kh in range(3):
        for kw in range(3):
            dh, dw = kh - 1, kw - 1
            off = dh * W + dw                               # flat tap offset
            shifts.append((-off) % HW)                      # roll: out[p] = xn[p+off]
            valid = ((hh + dh >= 0) & (hh + dh < H) &
                     (ww + dw >= 0) & (ww + dw < W))
            masks_np[kh * 3 + kw] = valid.astype(np.float32)
    masks = jnp.asarray(masks_np)

    kernel = functools.partial(_fused_myconv_kernel, C_real=C,
                               shifts=tuple(shifts), normalize=normalize)

    out_flat = pl.pallas_call(
        kernel,
        out_shape=jax.ShapeDtypeStruct((B, O, HW), x.dtype),
        grid=(1,),                                           # whole batch in one step
        in_specs=[
            pl.BlockSpec((B, C_pad, HW), lambda i: (0, 0, 0)),   # activations
            pl.BlockSpec((C_pad, HW), lambda i: (0, 0)),         # ln gamma
            pl.BlockSpec((C_pad, HW), lambda i: (0, 0)),         # ln beta
            pl.BlockSpec((O, 9 * C_pad), lambda i: (0, 0)),      # conv weight
            pl.BlockSpec((O, HW), lambda i: (0, 0)),             # conv bias (lane-dense)
            pl.BlockSpec((9, HW), lambda i: (0, 0)),             # tap masks
        ],
        out_specs=pl.BlockSpec((B, O, HW), lambda i: (0, 0, 0)),
        compiler_params=pltpu.CompilerParams(
            dimension_semantics=("arbitrary",),
            vmem_limit_bytes=32 * 1024 * 1024,   # safe on v7x's 64 MiB VMEM
        ),
    )(x_flat, gamma, beta, wmat, bias_hw, masks)

    return out_flat.reshape(B, O, H, W)                      # already NCHW-flat


# ---------------------------------------------------------------------------
# Pure-JAX reference (for validation only)
# ---------------------------------------------------------------------------
def reference_forward(x, params):
    mean = x.mean(axis=(1, 2, 3), keepdims=True)
    var = ((x - mean) ** 2).mean(axis=(1, 2, 3), keepdims=True)
    xn = (x - mean) * jax.lax.rsqrt(var + EPS)
    xn = xn * params["ln_gamma"][None] + params["ln_beta"][None]
    y = jax.lax.conv_general_dilated(
        xn, params["conv_w"], window_strides=(1, 1),
        padding=((1, 1), (1, 1)), dimension_numbers=("NCHW", "OIHW", "NCHW"))
    y = y + params["conv_b"][None, :, None, None]
    return y * jax.nn.sigmoid(y)


if __name__ == "__main__":
    B, C, O, H, W = 2, 4, 8, 16, 16
    key = jax.random.PRNGKey(0)
    k1, k2, k3, k4, k5 = jax.random.split(key, 5)

    x = jax.random.normal(k1, (B, C, H, W), jnp.float32)
    params = {
        # deterministic synthetic parameters (module __init__ defines the shapes)
        "ln_gamma": jnp.ones((C, H, W), jnp.float32)
                    + 0.05 * jax.random.normal(k2, (C, H, W), jnp.float32),
        "ln_beta": 0.05 * jax.random.normal(k3, (C, H, W), jnp.float32),
        "conv_w": (1.0 / np.sqrt(C * 9))
                  * jax.random.normal(k4, (O, C, 3, 3), jnp.float32),
        "conv_b": 0.1 * jax.random.normal(k5, (O,), jnp.float32),
    }

    y = my_conv_forward(x, params, normalize=True)
    y = jax.block_until_ready(y)

    y_ref = reference_forward(x, params)
    assert y.shape == (B, O, H, W)
    np.testing.assert_allclose(np.asarray(y), np.asarray(y_ref),
                               rtol=2e-2, atol=2e-3)
    print("KERNEL_OK")
</pallas_src>

<mosaic_0001>
module attributes {stable_mosaic.version = 11 : i64} {
  func.func @_fused_myconv_kernel(%arg0: i32, %arg1: memref<2x8x256xf32, #tpu.memory_space<vmem>>, %arg2: memref<8x256xf32, #tpu.memory_space<vmem>>, %arg3: memref<8x256xf32, #tpu.memory_space<vmem>>, %arg4: memref<8x72xf32, #tpu.memory_space<vmem>>, %arg5: memref<8x256xf32, #tpu.memory_space<vmem>>, %arg6: memref<9x256xf32, #tpu.memory_space<vmem>>, %arg7: memref<2x8x256xf32, #tpu.memory_space<vmem>>) attributes {dimension_semantics = [#tpu.dimension_semantics<arbitrary>], iteration_bounds = array<i64: 1>, scalar_prefetch = 0 : i64, scratch_operands = 0 : i64, tpu.core_type = #tpu.core_type<tc>, window_params = [{pipeline_mode = #tpu.pipeline_mode<synchronous>, transform_indices = @transform_0, window_bounds = array<i64: 2, 8, 256>}, {pipeline_mode = #tpu.pipeline_mode<synchronous>, transform_indices = @transform_1, window_bounds = array<i64: 8, 256>}, {pipeline_mode = #tpu.pipeline_mode<synchronous>, transform_indices = @transform_2, window_bounds = array<i64: 8, 256>}, {pipeline_mode = #tpu.pipeline_mode<synchronous>, transform_indices = @transform_3, window_bounds = array<i64: 8, 72>}, {pipeline_mode = #tpu.pipeline_mode<synchronous>, transform_indices = @transform_4, window_bounds = array<i64: 8, 256>}, {pipeline_mode = #tpu.pipeline_mode<synchronous>, transform_indices = @transform_5, window_bounds = array<i64: 9, 256>}, {pipeline_mode = #tpu.pipeline_mode<synchronous>, transform_indices = @transform_6, window_bounds = array<i64: 2, 8, 256>}]} {
    %c0 = arith.constant 0 : index
    %c0_0 = arith.constant 0 : index
    %0 = vector.load %arg2[%c0, %c0_0] : memref<8x256xf32, #tpu.memory_space<vmem>>, vector<8x256xf32>
    %c0_1 = arith.constant 0 : index
    %c0_2 = arith.constant 0 : index
    %1 = vector.load %arg3[%c0_1, %c0_2] : memref<8x256xf32, #tpu.memory_space<vmem>>, vector<8x256xf32>
    %c0_3 = arith.constant 0 : index
    %c0_4 = arith.constant 0 : index
    %2 = vector.load %arg6[%c0_3, %c0_4] : memref<9x256xf32, #tpu.memory_space<vmem>>, vector<9x256xf32>
    %c0_5 = arith.constant 0 : index
    %c0_6 = arith.constant 0 : index
    %c0_7 = arith.constant 0 : index
    %3 = vector.load %arg1[%c0_5, %c0_6, %c0_7] : memref<2x8x256xf32, #tpu.memory_space<vmem>>, vector<1x8x256xf32>
    %4 = vector.shape_cast %3 : vector<1x8x256xf32> to vector<8x256xf32>
    %5 = vector.shape_cast %4 : vector<8x256xf32> to vector<1x8x256xf32>
    %cst = arith.constant dense<0.000000e+00> : vector<1xf32>
    %6 = vector.multi_reduction <add>, %5, %cst [1, 2] : vector<1x8x256xf32> to vector<1xf32>
    %7 = vector.shape_cast %6 : vector<1xf32> to vector<1x1x1xf32>
    %8 = vector.extract %7[0, 0, 0] : f32 from vector<1x1x1xf32>
    %9 = arith.mulf %4, %4 : vector<8x256xf32>
    %10 = vector.shape_cast %9 : vector<8x256xf32> to vector<1x8x256xf32>
    %cst_8 = arith.constant dense<0.000000e+00> : vector<1xf32>
    %11 = vector.multi_reduction <add>, %10, %cst_8 [1, 2] : vector<1x8x256xf32> to vector<1xf32>
    %12 = vector.shape_cast %11 : vector<1xf32> to vector<1x1x1xf32>
    %13 = vector.extract %12[0, 0, 0] : f32 from vector<1x1x1xf32>
    %cst_9 = arith.constant 1.024000e+03 : f32
    %14 = arith.divf %8, %cst_9 : f32
    %cst_10 = arith.constant 1.024000e+03 : f32
    %15 = arith.divf %13, %cst_10 : f32
    %16 = arith.mulf %14, %14 : f32
    %17 = arith.subf %15, %16 : f32
    %cst_11 = arith.constant 9.99999974E-6 : f32
    %18 = arith.addf %17, %cst_11 : f32
    %19 = math.rsqrt %18 : f32
    %20 = vector.broadcast %14 : f32 to vector<8x256xf32>
    %21 = arith.subf %4, %20 : vector<8x256xf32>
    %22 = vector.broadcast %19 : f32 to vector<8x256xf32>
    %23 = arith.mulf %21, %22 : vector<8x256xf32>
    %24 = arith.mulf %23, %0 : vector<8x256xf32>
    %25 = arith.addf %24, %1 : vector<8x256xf32>
    %c17_i32 = arith.constant 17 : i32
    %26 = tpu.dynamic_rotate %25 by %c17_i32 dim 1 : vector<8x256xf32>, i32 -> vector<8x256xf32>
    %27 = vector.extract_strided_slice %2 {offsets = [0, 0], sizes = [1, 256], strides = [1, 1]} : vector<9x256xf32> to vector<1x256xf32>
    %28 = vector.broadcast %27 : vector<1x256xf32> to vector<8x256xf32>
    %29 = arith.mulf %26, %28 : vector<8x256xf32>
    %c16_i32 = arith.constant 16 : i32
    %30 = tpu.dynamic_rotate %25 by %c16_i32 dim 1 : vector<8x256xf32>, i32 -> vector<8x256xf32>
    %31 = vector.extract_strided_slice %2 {offsets = [1, 0], sizes = [1, 256], strides = [1, 1]} : vector<9x256xf32> to vector<1x256xf32>
    %32 = vector.broadcast %31 : vector<1x256xf32> to vector<8x256xf32>
    %33 = arith.mulf %30, %32 : vector<8x256xf32>
    %c15_i32 = arith.constant 15 : i32
    %34 = tpu.dynamic_rotate %25 by %c15_i32 dim 1 : vector<8x256xf32>, i32 -> vector<8x256xf32>
    %35 = vector.extract_strided_slice %2 {offsets = [2, 0], sizes = [1, 256], strides = [1, 1]} : vector<9x256xf32> to vector<1x256xf32>
    %36 = vector.broadcast %35 : vector<1x256xf32> to vector<8x256xf32>
    %37 = arith.mulf %34, %36 : vector<8x256xf32>
    %c1_i32 = arith.constant 1 : i32
    %38 = tpu.dynamic_rotate %25 by %c1_i32 dim 1 : vector<8x256xf32>, i32 -> vector<8x256xf32>
    %39 = vector.extract_strided_slice %2 {offsets = [3, 0], sizes = [1, 256], strides = [1, 1]} : vector<9x256xf32> to vector<1x256xf32>
    %40 = vector.broadcast %39 : vector<1x256xf32> to vector<8x256xf32>
    %41 = arith.mulf %38, %40 : vector<8x256xf32>
    %c255_i32 = arith.constant 255 : i32
    %42 = tpu.dynamic_rotate %25 by %c255_i32 dim 1 : vector<8x256xf32>, i32 -> vector<8x256xf32>
    %43 = vector.extract_strided_slice %2 {offsets = [5, 0], sizes = [1, 256], strides = [1, 1]} : vector<9x256xf32> to vector<1x256xf32>
    %44 = vector.broadcast %43 : vector<1x256xf32> to vector<8x256xf32>
    %45 = arith.mulf %42, %44 : vector<8x256xf32>
    %c241_i32 = arith.constant 241 : i32
    %46 = tpu.dynamic_rotate %25 by %c241_i32 dim 1 : vector<8x256xf32>, i32 -> vector<8x256xf32>
    %47 = vector.extract_strided_slice %2 {offsets = [6, 0], sizes = [1, 256], strides = [1, 1]} : vector<9x256xf32> to vector<1x256xf32>
    %48 = vector.broadcast %47 : vector<1x256xf32> to vector<8x256xf32>
    %49 = arith.mulf %46, %48 : vector<8x256xf32>
    %c240_i32 = arith.constant 240 : i32
    %50 = tpu.dynamic_rotate %25 by %c240_i32 dim 1 : vector<8x256xf32>, i32 -> vector<8x256xf32>
    %51 = vector.extract_strided_slice %2 {offsets = [7, 0], sizes = [1, 256], strides = [1, 1]} : vector<9x256xf32> to vector<1x256xf32>
    %52 = vector.broadcast %51 : vector<1x256xf32> to vector<8x256xf32>
    %53 = arith.mulf %50, %52 : vector<8x256xf32>
    %c239_i32 = arith.constant 239 : i32
    %54 = tpu.dynamic_rotate %25 by %c239_i32 dim 1 : vector<8x256xf32>, i32 -> vector<8x256xf32>
    %55 = vector.extract_strided_slice %2 {offsets = [8, 0], sizes = [1, 256], strides = [1, 1]} : vector<9x256xf32> to vector<1x256xf32>
    %56 = vector.broadcast %55 : vector<1x256xf32> to vector<8x256xf32>
    %57 = arith.mulf %54, %56 : vector<8x256xf32>
    %58 = tpu.concatenate %29, %33, %37, %41, %25, %45, %49, %53, %57 in 0 : vector<8x256xf32>, vector<8x256xf32>, vector<8x256xf32>, vector<8x256xf32>, vector<8x256xf32>, vector<8x256xf32>, vector<8x256xf32>, vector<8x256xf32>, vector<8x256xf32> -> vector<72x256xf32>
    %c1 = arith.constant 1 : index
    %c0_12 = arith.constant 0 : index
    %c0_13 = arith.constant 0 : index
    %59 = vector.load %arg1[%c1, %c0_12, %c0_13] : memref<2x8x256xf32, #tpu.memory_space<vmem>>, vector<1x8x256xf32>
    %60 = vector.shape_cast %59 : vector<1x8x256xf32> to vector<8x256xf32>
    %61 = vector.shape_cast %60 : vector<8x256xf32> to vector<1x8x256xf32>
    %cst_14 = arith.constant dense<0.000000e+00> : vector<1xf32>
    %62 = vector.multi_reduction <add>, %61, %cst_14 [1, 2] : vector<1x8x256xf32> to vector<1xf32>
    %63 = vector.shape_cast %62 : vector<1xf32> to vector<1x1x1xf32>
    %64 = vector.extract %63[0, 0, 0] : f32 from vector<1x1x1xf32>
    %65 = arith.mulf %60, %60 : vector<8x256xf32>
    %66 = vector.shape_cast %65 : vector<8x256xf32> to vector<1x8x256xf32>
    %cst_15 = arith.constant dense<0.000000e+00> : vector<1xf32>
    %67 = vector.multi_reduction <add>, %66, %cst_15 [1, 2] : vector<1x8x256xf32> to vector<1xf32>
    %68 = vector.shape_cast %67 : vector<1xf32> to vector<1x1x1xf32>
    %69 = vector.extract %68[0, 0, 0] : f32 from vector<1x1x1xf32>
    %cst_16 = arith.constant 1.024000e+03 : f32
    %70 = arith.divf %64, %cst_16 : f32
    %cst_17 = arith.constant 1.024000e+03 : f32
    %71 = arith.divf %69, %cst_17 : f32
    %72 = arith.mulf %70, %70 : f32
    %73 = arith.subf %71, %72 : f32
    %cst_18 = arith.constant 9.99999974E-6 : f32
    %74 = arith.addf %73, %cst_18 : f32
    %75 = math.rsqrt %74 : f32
    %76 = vector.broadcast %70 : f32 to vector<8x256xf32>
    %77 = arith.subf %60, %76 : vector<8x256xf32>
    %78 = vector.broadcast %75 : f32 to vector<8x256xf32>
    %79 = arith.mulf %77, %78 : vector<8x256xf32>
    %80 = arith.mulf %79, %0 : vector<8x256xf32>
    %81 = arith.addf %80, %1 : vector<8x256xf32>
    %c17_i32_19 = arith.constant 17 : i32
    %82 = tpu.dynamic_rotate %81 by %c17_i32_19 dim 1 : vector<8x256xf32>, i32 -> vector<8x256xf32>
    %83 = vector.extract_strided_slice %2 {offsets = [0, 0], sizes = [1, 256], strides = [1, 1]} : vector<9x256xf32> to vector<1x256xf32>
    %84 = vector.broadcast %83 : vector<1x256xf32> to vector<8x256xf32>
    %85 = arith.mulf %82, %84 : vector<8x256xf32>
    %c16_i32_20 = arith.constant 16 : i32
    %86 = tpu.dynamic_rotate %81 by %c16_i32_20 dim 1 : vector<8x256xf32>, i32 -> vector<8x256xf32>
    %87 = vector.extract_strided_slice %2 {offsets = [1, 0], sizes = [1, 256], strides = [1, 1]} : vector<9x256xf32> to vector<1x256xf32>
    %88 = vector.broadcast %87 : vector<1x256xf32> to vector<8x256xf32>
    %89 = arith.mulf %86, %88 : vector<8x256xf32>
    %c15_i32_21 = arith.constant 15 : i32
    %90 = tpu.dynamic_rotate %81 by %c15_i32_21 dim 1 : vector<8x256xf32>, i32 -> vector<8x256xf32>
    %91 = vector.extract_strided_slice %2 {offsets = [2, 0], sizes = [1, 256], strides = [1, 1]} : vector<9x256xf32> to vector<1x256xf32>
    %92 = vector.broadcast %91 : vector<1x256xf32> to vector<8x256xf32>
    %93 = arith.mulf %90, %92 : vector<8x256xf32>
    %c1_i32_22 = arith.constant 1 : i32
    %94 = tpu.dynamic_rotate %81 by %c1_i32_22 dim 1 : vector<8x256xf32>, i32 -> vector<8x256xf32>
    %95 = vector.extract_strided_slice %2 {offsets = [3, 0], sizes = [1, 256], strides = [1, 1]} : vector<9x256xf32> to vector<1x256xf32>
    %96 = vector.broadcast %95 : vector<1x256xf32> to vector<8x256xf32>
    %97 = arith.mulf %94, %96 : vector<8x256xf32>
    %c255_i32_23 = arith.constant 255 : i32
    %98 = tpu.dynamic_rotate %81 by %c255_i32_23 dim 1 : vector<8x256xf32>, i32 -> vector<8x256xf32>
    %99 = vector.extract_strided_slice %2 {offsets = [5, 0], sizes = [1, 256], strides = [1, 1]} : vector<9x256xf32> to vector<1x256xf32>
    %100 = vector.broadcast %99 : vector<1x256xf32> to vector<8x256xf32>
    %101 = arith.mulf %98, %100 : vector<8x256xf32>
    %c241_i32_24 = arith.constant 241 : i32
    %102 = tpu.dynamic_rotate %81 by %c241_i32_24 dim 1 : vector<8x256xf32>, i32 -> vector<8x256xf32>
    %103 = vector.extract_strided_slice %2 {offsets = [6, 0], sizes = [1, 256], strides = [1, 1]} : vector<9x256xf32> to vector<1x256xf32>
    %104 = vector.broadcast %103 : vector<1x256xf32> to vector<8x256xf32>
    %105 = arith.mulf %102, %104 : vector<8x256xf32>
    %c240_i32_25 = arith.constant 240 : i32
    %106 = tpu.dynamic_rotate %81 by %c240_i32_25 dim 1 : vector<8x256xf32>, i32 -> vector<8x256xf32>
    %107 = vector.extract_strided_slice %2 {offsets = [7, 0], sizes = [1, 256], strides = [1, 1]} : vector<9x256xf32> to vector<1x256xf32>
    %108 = vector.broadcast %107 : vector<1x256xf32> to vector<8x256xf32>
    %109 = arith.mulf %106, %108 : vector<8x256xf32>
    %c239_i32_26 = arith.constant 239 : i32
    %110 = tpu.dynamic_rotate %81 by %c239_i32_26 dim 1 : vector<8x256xf32>, i32 -> vector<8x256xf32>
    %111 = vector.extract_strided_slice %2 {offsets = [8, 0], sizes = [1, 256], strides = [1, 1]} : vector<9x256xf32> to vector<1x256xf32>
    %112 = vector.broadcast %111 : vector<1x256xf32> to vector<8x256xf32>
    %113 = arith.mulf %110, %112 : vector<8x256xf32>
    %114 = tpu.concatenate %85, %89, %93, %97, %81, %101, %105, %109, %113 in 0 : vector<8x256xf32>, vector<8x256xf32>, vector<8x256xf32>, vector<8x256xf32>, vector<8x256xf32>, vector<8x256xf32>, vector<8x256xf32>, vector<8x256xf32>, vector<8x256xf32> -> vector<72x256xf32>
    %115 = tpu.concatenate %58, %114 in 1 : vector<72x256xf32>, vector<72x256xf32> -> vector<72x512xf32>
    %c0_27 = arith.constant 0 : index
    %c0_28 = arith.constant 0 : index
    %116 = vector.load %arg4[%c0_27, %c0_28] : memref<8x72xf32, #tpu.memory_space<vmem>>, vector<8x72xf32>
    %cst_29 = arith.constant dense<0.000000e+00> : vector<8x512xf32>
    %117 = tpu.matmul %116, %115, %cst_29 {dimension_numbers = #tpu.dot_dimension_numbers<[1], [0], [0], [1], [0, 0, 1, 1], [], []>} : vector<8x72xf32>, vector<72x512xf32>, vector<8x512xf32> -> vector<8x512xf32>
    %c0_30 = arith.constant 0 : index
    %c0_31 = arith.constant 0 : index
    %118 = vector.load %arg5[%c0_30, %c0_31] : memref<8x256xf32, #tpu.memory_space<vmem>>, vector<8x256xf32>
    %119 = vector.extract_strided_slice %117 {offsets = [0, 0], sizes = [8, 256], strides = [1, 1]} : vector<8x512xf32> to vector<8x256xf32>
    %120 = arith.addf %119, %118 : vector<8x256xf32>
    %121 = arith.negf %120 : vector<8x256xf32>
    %122 = math.exp %121 : vector<8x256xf32>
    %cst_32 = arith.constant 1.000000e+00 : f32
    %123 = vector.broadcast %cst_32 : f32 to vector<8x256xf32>
    %124 = arith.addf %123, %122 : vector<8x256xf32>
    %125 = arith.divf %123, %124 : vector<8x256xf32>
    %126 = arith.mulf %120, %125 : vector<8x256xf32>
    %c0_33 = arith.constant 0 : index
    %c0_34 = arith.constant 0 : index
    %c0_35 = arith.constant 0 : index
    %127 = vector.load %arg7[%c0_33, %c0_34, %c0_35] : memref<2x8x256xf32, #tpu.memory_space<vmem>>, vector<1x8x256xf32>
    %128 = vector.shape_cast %127 : vector<1x8x256xf32> to vector<8x256xf32>
    %129 = vector.shape_cast %126 : vector<8x256xf32> to vector<1x8x256xf32>
    tpu.vector_store %arg7[%c0_33, %c0_34, %c0_35], %129 {strides = array<i32>} : memref<2x8x256xf32, #tpu.memory_space<vmem>>, vector<1x8x256xf32>,
    %130 = vector.extract_strided_slice %117 {offsets = [0, 256], sizes = [8, 256], strides = [1, 1]} : vector<8x512xf32> to vector<8x256xf32>
    %131 = arith.addf %130, %118 : vector<8x256xf32>
    %132 = arith.negf %131 : vector<8x256xf32>
    %133 = math.exp %132 : vector<8x256xf32>
    %cst_36 = arith.constant 1.000000e+00 : f32
    %134 = vector.broadcast %cst_36 : f32 to vector<8x256xf32>
    %135 = arith.addf %134, %133 : vector<8x256xf32>
    %136 = arith.divf %134, %135 : vector<8x256xf32>
    %137 = arith.mulf %131, %136 : vector<8x256xf32>
    %c1_37 = arith.constant 1 : index
    %c0_38 = arith.constant 0 : index
    %c0_39 = arith.constant 0 : index
    %138 = vector.load %arg7[%c1_37, %c0_38, %c0_39] : memref<2x8x256xf32, #tpu.memory_space<vmem>>, vector<1x8x256xf32>
    %139 = vector.shape_cast %138 : vector<1x8x256xf32> to vector<8x256xf32>
    %140 = vector.shape_cast %137 : vector<8x256xf32> to vector<1x8x256xf32>
    tpu.vector_store %arg7[%c1_37, %c0_38, %c0_39], %140 {strides = array<i32>} : memref<2x8x256xf32, #tpu.memory_space<vmem>>, vector<1x8x256xf32>,
    return
  }
  func.func @transform_0(%arg0: i32) -> (i32, i32, i32) {
    %c0_i32 = arith.constant 0 : i32
    %c0_i32_0 = arith.constant 0 : i32
    %c0_i32_1 = arith.constant 0 : i32
    %c0_i32_2 = arith.constant 0 : i32
    return %c0_i32, %c0_i32_0, %c0_i32_1 : i32, i32, i32
  }
  func.func @transform_1(%arg0: i32) -> (i32, i32) {
    %c0_i32 = arith.constant 0 : i32
    %c0_i32_0 = arith.constant 0 : i32
    %c0_i32_1 = arith.constant 0 : i32
    return %c0_i32, %c0_i32_0 : i32, i32
  }
  func.func @transform_2(%arg0: i32) -> (i32, i32) {
    %c0_i32 = arith.constant 0 : i32
    %c0_i32_0 = arith.constant 0 : i32
    %c0_i32_1 = arith.constant 0 : i32
    return %c0_i32, %c0_i32_0 : i32, i32
  }
  func.func @transform_3(%arg0: i32) -> (i32, i32) {
    %c0_i32 = arith.constant 0 : i32
    %c0_i32_0 = arith.constant 0 : i32
    %c0_i32_1 = arith.constant 0 : i32
    return %c0_i32, %c0_i32_0 : i32, i32
  }
  func.func @transform_4(%arg0: i32) -> (i32, i32) {
    %c0_i32 = arith.constant 0 : i32
    %c0_i32_0 = arith.constant 0 : i32
    %c0_i32_1 = arith.constant 0 : i32
    return %c0_i32, %c0_i32_0 : i32, i32
  }
  func.func @transform_5(%arg0: i32) -> (i32, i32) {
    %c0_i32 = arith.constant 0 : i32
    %c0_i32_0 = arith.constant 0 : i32
    %c0_i32_1 = arith.constant 0 : i32
    return %c0_i32, %c0_i32_0 : i32, i32
  }
  func.func @transform_6(%arg0: i32) -> (i32, i32, i32) {
    %c0_i32 = arith.constant 0 : i32
    %c0_i32_0 = arith.constant 0 : i32
    %c0_i32_1 = arith.constant 0 : i32
    %c0_i32_2 = arith.constant 0 : i32
    return %c0_i32, %c0_i32_0, %c0_i32_1 : i32, i32, i32
  }
}

</mosaic_0001>

<bundles_post_ra>
// kernel: tpu_custom_call.1
= control target key start
LH: loop header
LB: loop body
LE: loop exit
PB: predicated region body
PF: predicated region fallthrough
CT: control target
= control target key end

     0   :  { %11 = vsyncpa [#allocation3], 0  ;;  %s1199_s0 = inlined_call_operand.hbm [shape: f32[2,8,256], index: 0, kind: input, shape index: {}]   ;;  %s1200_s1 = inlined_call_operand.hbm [shape: f32[8,256], index: 1, kind: input, shape index: {}]   ;;  %s1201_s2 = inlined_call_operand.hbm [shape: f32[8,256], index: 2, kind: input, shape index: {}]   ;;  %s1202_s3 = inlined_call_operand.vmem [shape: f32[8,72], index: 3, kind: input, shape index: {}]   ;;  %s1203_s4 = inlined_call_operand.hbm [shape: f32[8,256], index: 4, kind: input, shape index: {}]   ;;  %s1204_s5 = inlined_call_operand.hbm [shape: f32[9,256], index: 5, kind: input, shape index: {}]   ;;  %s1205_s6 = inlined_call_operand.hbm [shape: f32[2,8,256], index: 6, kind: output, shape index: {}]  }
   0x1   :  { %12 = vsyncpa [#allocation6], 0 }
   0x2   :  { %13 = vsyncpa [#allocation9], 0 }
   0x3   :  { %14 = vsyncpa [#allocation4], 0  ;;  %s822_s21 = smov [#allocation5]   ;;  %s823_s23 = smov [#allocation8]  }
   0x4   :  { %s33_s22 = sshll.u32 %s822_s21, 4  ;;  %s55_s24 = sshll.u32 %s823_s23, 4  ;;  %s34_s22 = int_to_ptr.vmem [resolvable:$true] %s33_s22  ;;  %s56_s24 = int_to_ptr.vmem [resolvable:$true] %s55_s24 }
   0x5   :  { %s682_s27 = scalar_lea.hbm %s1200_s1, 256 }
   0x6   :  { %p683_p0 = scmp.ne.s32.totalorder %s1200_s1, %s682_s27  ;;  %p686_p1 = scmp.lt.u32.totalorder %s682_s27, %s1200_s1 }
   0x8   :  { %p688_p2 = pnand %p686_p1, %p683_p0 }
   0xa   :  { %691 = shalt.err (!%p688_p2)
}
   0xb   :  { %s692_s8 = scalar_lea.vmem %s34_s22, 256  ;;  %p697_p4 = scmp.lt.s32.totalorder %s34_s22, %s34_s22 }
   0xc   :  { %p693_p3 = scmp.ne.s32.totalorder %s34_s22, %s692_s8  ;;  %p698_p5 = scmp.lt.s32.totalorder %s692_s8, %s692_s8 }
   0xe   :  { %p699_p6 = por %p698_p5, %p697_p4 }
  0x10   :  { %p700_p7 = pnand %p699_p6, %p693_p3 }
  0x12   :  { %703 = shalt.err (!%p700_p7)
}
  0x13   :  { %36 = dma.hbm_to_vmem [thread:$0]  %s1200_s1, 256, %s34_s22, [#allocation6]  }
  0x14   :  { %s704_s13 = scalar_lea.hbm %s1203_s4, 256 }
  0x15   :  { %p705_p8 = scmp.ne.s32.totalorder %s1203_s4, %s704_s13  ;;  %p708_p9 = scmp.lt.u32.totalorder %s704_s13, %s1203_s4 }
  0x17   :  { %p710_p10 = pnand %p708_p9, %p705_p8 }
  0x19   :  { %713 = shalt.err (!%p710_p10)
}
  0x1a   :  { %s714_s18 = scalar_lea.vmem %s56_s24, 256  ;;  %p719_p12 = scmp.lt.s32.totalorder %s56_s24, %s56_s24 }
  0x1b   :  { %p715_p11 = scmp.ne.s32.totalorder %s56_s24, %s714_s18  ;;  %p720_p13 = scmp.lt.s32.totalorder %s714_s18, %s714_s18 }
  0x1d   :  { %p721_p0 = por %p720_p13, %p719_p12 }
  0x1f   :  { %p722_p1 = pnand %p721_p0, %p715_p11 }
  0x21   :  { %725 = shalt.err (!%p722_p1)
}
  0x22   :  { %58 = dma.hbm_to_vmem [thread:$0]  %s1203_s4, 256, %s56_s24, [#allocation9]  }
  0x23   :  { %s824_s20 = smov [#allocation2]   ;;  %s726_s25 = scalar_lea.hbm %s1199_s0, 512 }
  0x24   :  { %s20_s21 = sshll.u32 %s824_s20, 4  ;;  %p727_p2 = scmp.ne.s32.totalorder %s1199_s0, %s726_s25  ;;  %s21_s21 = int_to_ptr.vmem [resolvable:$true] %s20_s21 }
  0x25   :  { %p730_p3 = scmp.lt.u32.totalorder %s726_s25, %s1199_s0 }
  0x27   :  { %p732_p4 = pnand %p730_p3, %p727_p2 }
  0x29   :  { %735 = shalt.err (!%p732_p4)
}
  0x2a   :  { %s736_s30 = scalar_lea.vmem %s21_s21, 512  ;;  %p741_p6 = scmp.lt.s32.totalorder %s21_s21, %s21_s21 }
  0x2b   :  { %p737_p5 = scmp.ne.s32.totalorder %s21_s21, %s736_s30  ;;  %p742_p7 = scmp.lt.s32.totalorder %s736_s30, %s736_s30 }
  0x2d   :  { %p743_p8 = por %p742_p7, %p741_p6 }
  0x2f   :  { %p744_p9 = pnand %p743_p8, %p737_p5 }
  0x31   :  { %747 = shalt.err (!%p744_p9)
}
  0x32   :  { %s825_s4 = smov 256   ;;  %s826_s24 = smov 16  }
  0x33   :  { %26 = dma.hbm_to_vmem [thread:$0]  %s1199_s0, 512, %s21_s21, [#allocation3], %s825_s4, %s825_s4, %s826_s24  }
  0x34   :  { %s827_s9 = smov [#allocation7]   ;;  %s828_s11 = smov [#allocation10]  }
  0x35   :  { %s43_s10 = sshll.u32 %s827_s9, 4  ;;  %s64_s12 = sshll.u32 %s828_s11, 4  ;;  %s44_s10 = int_to_ptr.vmem [resolvable:$true] %s43_s10  ;;  %s65_s12 = int_to_ptr.vmem [resolvable:$true] %s64_s12 }
  0x36   :  { %s748_s15 = scalar_lea.hbm %s1201_s2, 256 }
  0x37   :  { %p749_p10 = scmp.ne.s32.totalorder %s1201_s2, %s748_s15  ;;  %p752_p11 = scmp.lt.u32.totalorder %s748_s15, %s1201_s2 }
  0x39   :  { %p754_p12 = pnand %p752_p11, %p749_p10 }
  0x3b   :  { %757 = shalt.err (!%p754_p12)
}
  0x3c   :  { %s758_s0 = scalar_lea.vmem %s44_s10, 256  ;;  %p763_p0 = scmp.lt.s32.totalorder %s44_s10, %s44_s10 }
  0x3d   :  { %p759_p13 = scmp.ne.s32.totalorder %s44_s10, %s758_s0  ;;  %p764_p1 = scmp.lt.s32.totalorder %s758_s0, %s758_s0 }
  0x3f   :  { %p765_p2 = por %p764_p1, %p763_p0 }
  0x41   :  { %p766_p3 = pnand %p765_p2, %p759_p13 }
  0x43   :  { %769 = shalt.err (!%p766_p3)
}
  0x44   :  { %46 = dma.hbm_to_vmem [thread:$0]  %s1201_s2, 256, %s44_s10, [#allocation6]  }
  0x45   :  { %s770_s23 = scalar_lea.hbm %s1204_s5, 512 }
  0x46   :  { %p771_p4 = scmp.ne.s32.totalorder %s1204_s5, %s770_s23  ;;  %p774_p5 = scmp.lt.u32.totalorder %s770_s23, %s1204_s5 }
  0x48   :  { %p776_p6 = pnand %p774_p5, %p771_p4 }
  0x4a   :  { %779 = shalt.err (!%p776_p6)
}
  0x4b   :  { %s780_s29 = scalar_lea.vmem %s65_s12, 512  ;;  %p785_p8 = scmp.lt.s32.totalorder %s65_s12, %s65_s12 }
  0x4c   :  { %p781_p7 = scmp.ne.s32.totalorder %s65_s12, %s780_s29  ;;  %p786_p9 = scmp.lt.s32.totalorder %s780_s29, %s780_s29 }
  0x4e   :  { %p787_p10 = por %p786_p9, %p785_p8 }
  0x50   :  { %p788_p11 = pnand %p787_p10, %p781_p7 }
  0x52   :  { %791 = shalt.err (!%p788_p11)
}
  0x53   :  { %70 = dma.hbm_to_vmem [thread:$0]  %s1204_s5, 512, %s65_s12, [#allocation9], %s825_s4, %s825_s4, %s826_s24  }
  0x54   :  { %814 = dma.done.wait [#allocation3], 512  }
  0x55   :  { %815 = vsyncadd [#allocation3], 4294966784 }
  0x56   :  { %816 = dma.done.wait [#allocation6], 512  }
  0x57   :  { %817 = vsyncadd [#allocation6], 4294966784 }
  0x58   :  { %818 = dma.done.wait [#allocation9], 768  }
  0x59   :  { %819 = vsyncadd [#allocation9], 4294966528  ;;  %v94_v0 = vld [vmem:[#allocation2] sm:$0xff]  ;;  %v95_v1 = vld [vmem:[#allocation2 + $0x8] sm:$0xff]  ;;  %s829_s19 = smov 17   ;;  %s830_s20 = smov 15  }
  0x5a   :  { %v939_v2 = vld [vmem:[#allocation2 + $0x10] sm:$0xff]  ;;  %v96_v3 = vadd.f32 %v95_v1, %v94_v0  ;;  %v106_v4 = vmul.f32 %v94_v0, %v94_v0  ;;  %v107_v5 = vmul.f32 %v95_v1, %v95_v1  ;;  %v941_v6 = vld [vmem:[#allocation2 + $0x18] sm:$0xff]  ;;  %v86_v45 = vld [vmem:[#allocation5] sm:$0xff]  ;;  %s831_s21 = smov 1   ;;  %s832_s22 = smov 127   ;;  %vm390_vm8 = vcmask 588800  }
  0x5b   :  { %v291_v7 = vmul.f32 %v939_v2, %v939_v2  ;;  %v281_v8 = vadd.f32 %v941_v6, %v939_v2  ;;  %v292_v9 = vmul.f32 %v941_v6, %v941_v6  ;;  %v87_v46 = vld [vmem:[#allocation5 + $0x8] sm:$0xff]  ;;  %v88_v50 = vld [vmem:[#allocation7] sm:$0xff]  ;;  %v89_v51 = vld [vmem:[#allocation7 + $0x8] sm:$0xff]  ;;  %s833_s23 = smov 113   ;;  %s834_s25 = smov 112  }
  0x5c   :  { %97 = vadd.xlane.f32.xlu0 %v96_v3  ;;  %v108_v10 = vadd.f32 %v107_v5, %v106_v4  ;;  %s836_s27 = smov 111   ;;  %v144_v5 = vlaneseq }
  0x5d   :  { %282 = vadd.xlane.f32.xlu1 %v281_v8  ;;  %v293_v11 = vadd.f32 %v292_v9, %v291_v7 }
  0x5e   :  { %v1022_v8 = vand.u32 127, %v144_v5 }
  0x60   :  { %109 = vadd.xlane.f32.xlu0 %v108_v10  ;;  %vm146_vm0 = vcmp.lt.s32.totalorder %v1022_v8, 17  ;;  %vm163_vm1 = vcmp.lt.s32.totalorder %v1022_v8, 16  ;;  %vm180_vm2 = vcmp.lt.s32.totalorder %v1022_v8, 15  ;;  %vm197_vm3 = vcmp.lt.s32.totalorder %v1022_v8, 1 }
  0x61   :  { %294 = vadd.xlane.f32.xlu1 %v293_v11  ;;  %v1025_v11 = vld [vmem:[#allocation10] sm:$0xff]  ;;  %vm214_vm4 = vcmp.lt.s32.totalorder %v1022_v8, 127  ;;  %vm231_vm5 = vcmp.lt.s32.totalorder %v1022_v8, 113  ;;  %vm248_vm6 = vcmp.lt.s32.totalorder %v1022_v8, 112  ;;  %vm265_vm7 = vcmp.lt.s32.totalorder %v1022_v8, 111 }
  0xe9   :  { %v98_v12 = vpop.xlane.xlu0 %97 }
  0xea   :  { %v99_v13 = vrot.slane %v98_v12, 4  ;;  %v283_v26 = vpop.xlane.xlu1 %282 }
  0xeb   :  { %v284_v28 = vrot.slane %v283_v26, 4 }
  0xec   :  { %v100_v14 = vadd.f32 %v99_v13, %v98_v12  ;;  %v1028_v13 = vld [vmem:[#allocation10 + $0x8] sm:$0xff] }
  0xed   :  { %v110_v15 = vpop.xlane.xlu0 %109  ;;  %v285_v30 = vadd.f32 %v284_v28, %v283_v26 }
  0xee   :  { %v101_v16 = vrot.slane %v100_v14, 2  ;;  %v111_v17 = vrot.slane %v110_v15, 4  ;;  %v295_v27 = vpop.xlane.xlu1 %294 }
  0xef   :  { %v296_v29 = vrot.slane %v295_v27, 4  ;;  %v286_v32 = vrot.slane %v285_v30, 2 }
  0xf0   :  { %v112_v18 = vadd.f32 %v111_v17, %v110_v15  ;;  %v102_v19 = vadd.f32 %v101_v16, %v100_v14 }
  0xf1   :  { %v297_v31 = vadd.f32 %v296_v29, %v295_v27  ;;  %v287_v35 = vadd.f32 %v286_v32, %v285_v30 }
  0xf2   :  { %v113_v20 = vrot.slane %v112_v18, 2  ;;  %v103_v21 = vrot.slane %v102_v19, 1 }
  0xf3   :  { %v298_v34 = vrot.slane %v297_v31, 2  ;;  %v288_v37 = vrot.slane %v287_v35, 1 }
  0xf4   :  { %v104_v22 = vadd.f32 %v103_v21, %v102_v19  ;;  %v114_v23 = vadd.f32 %v113_v20, %v112_v18 }
  0xf5   :  { %v299_v36 = vadd.f32 %v298_v34, %v297_v31  ;;  %v289_v40 = vadd.f32 %v288_v37, %v287_v35 }
  0xf6   :  { %634 = vpush %v104_v22  ;;  %v115_v24 = vrot.slane %v114_v23, 1 }
  0xf7   :  { %v300_v38 = vrot.slane %v299_v36, 1 }
  0xf8   :  { %v116_v25 = vadd.f32 %v115_v24, %v114_v23 }
  0xf9   :  { %v301_v41 = vadd.f32 %v300_v38, %v299_v36 }
  0xfa   :  { %636 = vpush %v116_v25 }
 0x127   :  { %s635_s5 = spop %634 }
 0x128   :  { %s120_s7 = smul.f32 0.0009765625, %s635_s5 }
 0x12a   :  { %s124_s8 = smul.f32 %s120_s7, %s120_s7  ;;  %v130_v42 = vstv %s120_s7 }
 0x12b   :  { %s637_s9 = spop %636  ;;  %v131_v43 = vsub.f32 %v94_v0, %v130_v42  ;;  %v132_v44 = vsub.f32 %v95_v1, %v130_v42 }
 0x12c   :  { %s123_s10 = smul.f32 0.0009765625, %s637_s9 }
 0x12e   :  { %s125_s11 = ssub.f32 %s123_s10, %s124_s8 }
 0x130   :  { %s126_s12 = sadd.f32 1e-05, %s125_s11 }
 0x132   :  { %v127_v33 = vstv %s126_s12 }
 0x133   :  { %662 = vrsqrt.f32 %v127_v33 }
 0x13d   :  { %v663_v39 = vpop.eup %662 }
 0x13e   :  { %638 = vpush %v663_v39 }
 0x13f   :  { %640 = vpush %v289_v40 }
 0x140   :  { %642 = vpush %v301_v41 }
 0x16f   :  { %s639_s13 = spop %638 }
 0x170   :  { %v133_v47 = vstv %s639_s13  ;;  %s641_s14 = spop %640 }
 0x171   :  { %v134_v48 = vmul.f32 %v133_v47, %v131_v43  ;;  %v135_v49 = vmul.f32 %v133_v47, %v132_v44  ;;  %s949_s15 = smul.f32 0.0009765625, %s641_s14  ;;  %s643_s16 = spop %642 }
 0x172   :  { %s308_s17 = smul.f32 0.0009765625, %s643_s16 }
 0x173   :  { %v136_v52 = vmul.f32 %v134_v48, %v86_v45  ;;  %v137_v53 = vmul.f32 %v135_v49, %v87_v46  ;;  %s309_s18 = smul.f32 %s949_s15, %s949_s15  ;;  %v315_v58 = vstv %s949_s15 }
 0x174   :  { %v316_v59 = vsub.f32 %v939_v2, %v315_v58  ;;  %v317_v60 = vsub.f32 %v941_v6, %v315_v58  ;;  %v835_v2 = vmov 0.0   ;;  %v1020_v6 = vshrl.u32 %v144_v5, 7 }
 0x175   :  { %v953_v54 = vadd.f32 %v136_v52, %v88_v50  ;;  %v955_v55 = vadd.f32 %v137_v53, %v89_v51  ;;  %s310_s1 = ssub.f32 %s308_s17, %s309_s18  ;;  %458 = vmatprep.mubr.f32.mxu0 %v835_v2  ;;  %529 = vmatprep.mubr.f32.mxu1 %v835_v2 }
 0x176   :  { %v151_v10 = vsub.s32 0, %v1020_v6  ;;  %v168_v12 = vsub.s32 1, %v1020_v6  ;;  %v185_v25 = vsub.s32 2, %v1020_v6  ;;  %v202_v26 = vsub.s32 3, %v1020_v6 }
 0x177   :  { %s311_s0 = sadd.f32 1e-05, %s310_s1  ;;  %142 = vrot.lane.b32.xlu1 %v955_v55, %s829_s19  ;;  %140 = vrot.lane.b32.xlu0 %v953_v54, %s829_s19  ;;  %v219_v36 = vsub.s32 5, %v1020_v6 }
 0x178   :  { %v1032_v16 = vrot.slane %v1025_v11, %v151_v10  ;;  %v1036_v17 = vrot.slane %v1025_v11, %v168_v12  ;;  %v1039_v18 = vrot.slane %v1028_v13, %v151_v10  ;;  %v1042_v19 = vrot.slane %v1028_v13, %v168_v12 }
 0x179   :  { %v312_v56 = vstv %s311_s0  ;;  %v1060_v35 = vrot.slane %v1025_v11, %v185_v25  ;;  %v1064_v37 = vrot.slane %v1028_v13, %v185_v25  ;;  %v1068_v38 = vrot.slane %v1025_v11, %v202_v26 }
 0x17a   :  { %664 = vrsqrt.f32 %v312_v56  ;;  %v1071_v39 = vrot.slane %v1028_v13, %v202_v26  ;;  %v1086_v47 = vrot.slane %v1028_v13, %v219_v36 }
 0x17b   :  { %159 = vrot.lane.b32.xlu1 %v953_v54, %s826_s24  ;;  %176 = vrot.lane.b32.xlu0 %v953_v54, %s830_s20 }
 0x17f   :  { %161 = vrot.lane.b32.xlu1 %v955_v55, %s826_s24  ;;  %193 = vrot.lane.b32.xlu0 %v953_v54, %s831_s21 }
 0x183   :  { %178 = vrot.lane.b32.xlu1 %v955_v55, %s830_s20  ;;  %210 = vrot.lane.b32.xlu0 %v953_v54, %s832_s22 }
 0x184   :  { %v665_v57 = vpop.eup %664 }
 0x185   :  { %644 = vpush %v665_v57 }
 0x187   :  { %195 = vrot.lane.b32.xlu1 %v955_v55, %s831_s21  ;;  %227 = vrot.lane.b32.xlu0 %v953_v54, %s833_s23 }
 0x18b   :  { %212 = vrot.lane.b32.xlu1 %v955_v55, %s832_s22  ;;  %244 = vrot.lane.b32.xlu0 %v953_v54, %s834_s25 }
 0x18f   :  { %229 = vrot.lane.b32.xlu1 %v955_v55, %s833_s23 }
 0x193   :  { %246 = vrot.lane.b32.xlu1 %v955_v55, %s834_s25 }
 0x1b6   :  { %s645_s26 = spop %644 }
 0x1b7   :  { %v318_v61 = vstv %s645_s26 }
 0x1b8   :  { %v319_v62 = vmul.f32 %v318_v61, %v316_v59  ;;  %v320_v63 = vmul.f32 %v318_v61, %v317_v60  ;;  %v236_v59 = vsub.s32 6, %v1020_v6 }
 0x1ba   :  { %v321_v0 = vmul.f32 %v319_v62, %v86_v45  ;;  %v322_v1 = vmul.f32 %v320_v63, %v87_v46  ;;  %v1083_v46 = vrot.slane %v1025_v11, %v219_v36  ;;  %v253_v63 = vsub.s32 7, %v1020_v6 }
 0x1bb   :  { %v1104_v5 = vrot.slane %v1025_v11, %v236_v59 }
 0x1bc   :  { %v986_v3 = vadd.f32 %v321_v0, %v88_v50  ;;  %v988_v4 = vadd.f32 %v322_v1, %v89_v51  ;;  %v1114_v6 = vrot.slane %v1028_v13, %v253_v63 }
 0x1be   :  { %327 = vrot.lane.b32.xlu1 %v988_v4, %s829_s19  ;;  %325 = vrot.lane.b32.xlu0 %v986_v3, %s829_s19 }
 0x1c2   :  { %335 = vrot.lane.b32.xlu1 %v988_v4, %s826_s24  ;;  %333 = vrot.lane.b32.xlu0 %v986_v3, %s826_s24 }
 0x1c6   :  { %343 = vrot.lane.b32.xlu1 %v988_v4, %s830_s20  ;;  %341 = vrot.lane.b32.xlu0 %v986_v3, %s830_s20 }
 0x1ca   :  { %351 = vrot.lane.b32.xlu1 %v988_v4, %s831_s21  ;;  %349 = vrot.lane.b32.xlu0 %v986_v3, %s831_s21 }
 0x1ce   :  { %359 = vrot.lane.b32.xlu1 %v988_v4, %s832_s22  ;;  %357 = vrot.lane.b32.xlu0 %v986_v3, %s832_s22 }
 0x1d2   :  { %367 = vrot.lane.b32.xlu1 %v988_v4, %s833_s23  ;;  %365 = vrot.lane.b32.xlu0 %v986_v3, %s833_s23 }
 0x1d6   :  { %375 = vrot.lane.b32.xlu1 %v988_v4, %s834_s25  ;;  %373 = vrot.lane.b32.xlu0 %v986_v3, %s834_s25 }
 0x1da   :  { %263 = vrot.lane.b32.xlu1 %v955_v55, %s836_s27  ;;  %261 = vrot.lane.b32.xlu0 %v953_v54, %s836_s27 }
 0x1de   :  { %383 = vrot.lane.b32.xlu1 %v988_v4, %s836_s27  ;;  %381 = vrot.lane.b32.xlu0 %v986_v3, %s836_s27 }
 0x1e9   :  { %v143_v7 = vpop.permute.xlu1 %142  ;;  %v141_v9 = vpop.permute.xlu0 %140 }
 0x1ea   :  { %v147_v20 = vsel %vm146_vm0, %v141_v9, %v143_v7  ;;  %v148_v21 = vsel %vm146_vm0, %v143_v7, %v141_v9  ;;  %v1107_v7 = vrot.slane %v1028_v13, %v236_v59  ;;  %v1111_v9 = vrot.slane %v1025_v11, %v253_v63 }
 0x1eb   :  { %v157_v27 = vmul.f32 %v1032_v16, %v148_v21  ;;  %v158_v30 = vmul.f32 %v1039_v18, %v147_v20 }
 0x1ed   :  { %v160_v14 = vpop.permute.xlu1 %159  ;;  %v177_v15 = vpop.permute.xlu0 %176 }
 0x1f1   :  { %v162_v22 = vpop.permute.xlu1 %161  ;;  %v194_v29 = vpop.permute.xlu0 %193 }
 0x1f2   :  { %v164_v23 = vsel %vm163_vm1, %v160_v14, %v162_v22  ;;  %v165_v24 = vsel %vm163_vm1, %v162_v22, %v160_v14 }
 0x1f3   :  { %v174_v28 = vmul.f32 %v1036_v17, %v165_v24  ;;  %v175_v31 = vmul.f32 %v1042_v19, %v164_v23 }
 0x1f5   :  { %v179_v32 = vpop.permute.xlu1 %178  ;;  %v602_v33 = vpack.c.bf16 %v175_v31, %v158_v30  ;;  %v604_v34 = vpack.c.bf16 %v174_v28, %v157_v27  ;;  %v211_v42 = vpop.permute.xlu0 %210 }
 0x1f6   :  { %v181_v40 = vsel %vm180_vm2, %v177_v15, %v179_v32  ;;  %v182_v41 = vsel %vm180_vm2, %v179_v32, %v177_v15 }
 0x1f7   :  { %603 = vmatprep.subr.bf16.mxu0 %v602_v33  ;;  %v191_v48 = vmul.f32 %v1060_v35, %v182_v41  ;;  %v192_v49 = vmul.f32 %v1064_v37, %v181_v40 }
 0x1f8   :  { %605 = vmatpush1.bf16.msra.mxu0 %v604_v34 }
 0x1f9   :  { %v196_v43 = vpop.permute.xlu1 %195  ;;  %v228_v60 = vpop.permute.xlu0 %227 }
 0x1fa   :  { %v198_v44 = vsel %vm197_vm3, %v194_v29, %v196_v43  ;;  %v199_v45 = vsel %vm197_vm3, %v196_v43, %v194_v29 }
 0x1fb   :  { %v208_v50 = vmul.f32 %v1068_v38, %v199_v45  ;;  %v209_v51 = vmul.f32 %v1071_v39, %v198_v44 }
 0x1fd   :  { %v213_v52 = vpop.permute.xlu1 %212  ;;  %v606_v53 = vpack.c.bf16 %v209_v51, %v192_v49  ;;  %v608_v56 = vpack.c.bf16 %v208_v50, %v191_v48  ;;  %v245_v10 = vpop.permute.xlu0 %244 }
 0x1fe   :  { %v215_v57 = vsel %vm214_vm4, %v211_v42, %v213_v52  ;;  %v216_v58 = vsel %vm214_vm4, %v213_v52, %v211_v42 }
 0x1ff   :  { %v225_v61 = vmul.f32 %v1083_v46, %v215_v57  ;;  %v226_v62 = vmul.f32 %v1086_v47, %v216_v58  ;;  %607 = vmatprep.subr.bf16.mxu0 %v606_v53 }
 0x200   :  { %609 = vmatpush1.bf16.msra.mxu0 %v608_v56 }
 0x201   :  { %v230_v0 = vpop.permute.xlu1 %229  ;;  %v610_v1 = vpack.c.bf16 %v226_v62, %v955_v55  ;;  %v612_v2 = vpack.c.bf16 %v225_v61, %v953_v54 }
 0x202   :  { %v232_v55 = vsel %vm231_vm5, %v228_v60, %v230_v0  ;;  %v233_v54 = vsel %vm231_vm5, %v230_v0, %v228_v60 }
 0x203   :  { %611 = vmatprep.subr.bf16.mxu0 %v610_v1  ;;  %v242_v11 = vmul.f32 %v1104_v5, %v232_v55  ;;  %v243_v13 = vmul.f32 %v1107_v7, %v233_v54  ;;  %v594_v54 = vld [vmem:[#allocation10 + $0x10] ss:$0 sm:$0xff] }
 0x204   :  { %613 = vmatpush1.bf16.msra.mxu0 %v612_v2 }
 0x205   :  { %v247_v12 = vpop.permute.xlu1 %246 }
 0x206   :  { %v249_v14 = vsel %vm248_vm6, %v245_v10, %v247_v12  ;;  %v250_v15 = vsel %vm248_vm6, %v247_v12, %v245_v10  ;;  %v595_v10 = vld [vmem:[#allocation10 + $0x18] ss:$0 sm:$0xff] }
 0x207   :  { %v259_v20 = vmul.f32 %v1111_v9, %v249_v14  ;;  %v260_v21 = vmul.f32 %v1114_v6, %v250_v15 }
 0x209   :  { %v614_v22 = vpack.c.bf16 %v260_v21, %v243_v13  ;;  %v616_v23 = vpack.c.bf16 %v259_v20, %v242_v11 }
 0x20b   :  { %615 = vmatprep.subr.bf16.mxu0 %v614_v22 }
 0x20c   :  { %617 = vmatpush1.bf16.msra.mxu0 %v616_v23 }
 0x230   :  { %v328_v24 = vpop.permute.xlu1 %327  ;;  %v326_v25 = vpop.permute.xlu0 %325 }
 0x231   :  { %v329_v26 = vsel %vm146_vm0, %v326_v25, %v328_v24  ;;  %v330_v27 = vsel %vm146_vm0, %v328_v24, %v326_v25 }
 0x232   :  { %v331_v32 = vmul.f32 %v330_v27, %v1032_v16  ;;  %v332_v34 = vmul.f32 %v329_v26, %v1039_v18  ;;  %v536_v26 = vld [vmem:[#allocation8] sm:$0xff]  ;;  %v537_v27 = vld [vmem:[#allocation8 + $0x8] sm:$0xff] }
 0x234   :  { %v336_v28 = vpop.permute.xlu1 %335  ;;  %v334_v29 = vpop.permute.xlu0 %333 }
 0x235   :  { %v337_v30 = vsel %vm163_vm1, %v334_v29, %v336_v28  ;;  %v338_v31 = vsel %vm163_vm1, %v336_v28, %v334_v29 }
 0x236   :  { %v339_v33 = vmul.f32 %v338_v31, %v1036_v17  ;;  %v340_v36 = vmul.f32 %v337_v30, %v1042_v19 }
 0x238   :  { %v344_v40 = vpop.permute.xlu1 %343  ;;  %v342_v41 = vpop.permute.xlu0 %341  ;;  %v618_v42 = vpack.c.bf16 %v340_v36, %v332_v34  ;;  %v620_v43 = vpack.c.bf16 %v339_v33, %v331_v32 }
 0x239   :  { %v345_v44 = vsel %vm180_vm2, %v342_v41, %v344_v40  ;;  %v346_v45 = vsel %vm180_vm2, %v344_v40, %v342_v41 }
 0x23a   :  { %619 = vmatprep.subr.bf16.mxu1 %v618_v42  ;;  %v347_v19 = vmul.f32 %v346_v45, %v1060_v35  ;;  %v348_v49 = vmul.f32 %v345_v44, %v1064_v37 }
 0x23b   :  { %621 = vmatpush1.bf16.msra.mxu1 %v620_v43 }
 0x23c   :  { %v352_v48 = vpop.permute.xlu1 %351  ;;  %v350_v16 = vpop.permute.xlu0 %349 }
 0x23d   :  { %v353_v17 = vsel %vm197_vm3, %v350_v16, %v352_v48  ;;  %v354_v18 = vsel %vm197_vm3, %v352_v48, %v350_v16 }
 0x23e   :  { %v355_v50 = vmul.f32 %v354_v18, %v1068_v38  ;;  %v356_v51 = vmul.f32 %v353_v17, %v1071_v39 }
 0x240   :  { %v360_v52 = vpop.permute.xlu1 %359  ;;  %v358_v53 = vpop.permute.xlu0 %357  ;;  %v622_v56 = vpack.c.bf16 %v356_v51, %v348_v49  ;;  %v624_v57 = vpack.c.bf16 %v355_v50, %v347_v19 }
 0x241   :  { %v361_v58 = vsel %vm214_vm4, %v358_v53, %v360_v52  ;;  %v362_v59 = vsel %vm214_vm4, %v360_v52, %v358_v53 }
 0x242   :  { %v363_v60 = vmul.f32 %v361_v58, %v1083_v46  ;;  %v364_v35 = vmul.f32 %v362_v59, %v1086_v47  ;;  %623 = vmatprep.subr.bf16.mxu1 %v622_v56 }
 0x243   :  { %625 = vmatpush1.bf16.msra.mxu1 %v624_v57 }
 0x244   :  { %v368_v37 = vpop.permute.xlu1 %367  ;;  %v366_v38 = vpop.permute.xlu0 %365  ;;  %v626_v39 = vpack.c.bf16 %v364_v35, %v988_v4  ;;  %v628_v61 = vpack.c.bf16 %v363_v60, %v986_v3 }
 0x245   :  { %v369_v62 = vsel %vm231_vm5, %v366_v38, %v368_v37  ;;  %v370_v63 = vsel %vm231_vm5, %v368_v37, %v366_v38 }
 0x246   :  { %627 = vmatprep.subr.bf16.mxu1 %v626_v39  ;;  %v371_v3 = vmul.f32 %v369_v62, %v1104_v5  ;;  %v372_v4 = vmul.f32 %v370_v63, %v1107_v7  ;;  %v389_v7 = vld [vmem:[%s1202_s3] sm:$0xff]  ;;  %s837_s3 = smov [#allocation11]  }
 0x247   :  { %629 = vmatpush1.bf16.msra.mxu1 %v628_v61  ;;  %s580_s2 = sshll.u32 %s837_s3, 4  ;;  %s581_s2 = int_to_ptr.vmem [resolvable:$true] %s580_s2 }
 0x248   :  { %v376_v0 = vpop.permute.xlu1 %375  ;;  %v374_v46 = vpop.permute.xlu0 %373  ;;  %s792_s30 = scalar_lea.vmem %s581_s2, 512  ;;  %p797_p13 = scmp.lt.s32.totalorder %s581_s2, %s581_s2 }
 0x249   :  { %v377_v47 = vsel %vm248_vm6, %v374_v46, %v376_v0  ;;  %v378_v1 = vsel %vm248_vm6, %v376_v0, %v374_v46  ;;  %p793_p12 = scmp.ne.s32.totalorder %s581_s2, %s792_s30  ;;  %p798_p0 = scmp.lt.s32.totalorder %s792_s30, %s792_s30 }
 0x24a   :  { %v379_v2 = vmul.f32 %v377_v47, %v1111_v9  ;;  %v380_v55 = vmul.f32 %v378_v1, %v1114_v6 }
 0x24b   :  { %p799_p1 = por %p798_p0, %p797_p13 }
 0x24c   :  { %v264_v12 = vpop.permute.xlu1 %263  ;;  %v262_v14 = vpop.permute.xlu0 %261  ;;  %v630_v15 = vpack.c.bf16 %v380_v55, %v372_v4  ;;  %v632_v11 = vpack.c.bf16 %v379_v2, %v371_v3 }
 0x24d   :  { %v266_v13 = vsel %vm265_vm7, %v262_v14, %v264_v12  ;;  %v267_v20 = vsel %vm265_vm7, %v264_v12, %v262_v14  ;;  %p800_p2 = pnand %p799_p1, %p793_p12 }
 0x24e   :  { %v276_v21 = vmul.f32 %v594_v54, %v266_v13  ;;  %v277_v5 = vmul.f32 %v595_v10, %v267_v20  ;;  %631 = vmatprep.subr.bf16.mxu1 %v630_v15 }
 0x24f   :  { %633 = vmatpush1.bf16.msra.mxu1 %v632_v11 }
 0x250   :  { %v384_v9 = vpop.permute.xlu1 %383  ;;  %410 = vmatprep.subr.mxu0 %v277_v5  ;;  %v382_v6 = vpop.permute.xlu0 %381 }
 0x251   :  { %v385_v22 = vsel %vm265_vm7, %v382_v6, %v384_v9  ;;  %v386_v23 = vsel %vm265_vm7, %v384_v9, %v382_v6  ;;  %411 = vmatpush1.msra.mxu0 %v276_v21 }
 0x252   :  { %v387_v24 = vmul.f32 %v594_v54, %v385_v22  ;;  %v388_v25 = vmul.f32 %v595_v10, %v386_v23  ;;  %596 = vmatmul.mubr.msk.f32.vlgmr.msra.gmra.mrb[0].mxu0 %vm390_vm8, %v389_v7 }
 0x254   :  { %481 = vmatprep.subr.mxu1 %v388_v25 }
 0x255   :  { %482 = vmatpush1.msra.mxu1 %v387_v24 }
 0x256   :  { %597 = vmatmul.mubr.msk.f32.vlgmr.msra.gmra.mrb[0].mxu1 %vm390_vm8, %v389_v7 }
 0x325   :  { %v460_v28 = vpop.f32.mrb[0].mxu0 }
 0x326   :  { %v538_v29 = vadd.f32 %v536_v26, %v460_v28  ;;  %v462_v30 = vpop.f32.mrb[1].mxu0 }
 0x327   :  { %v539_v31 = vadd.f32 %v537_v27, %v462_v30 }
 0x328   :  { %v598_v32 = vmul.f32 -1.442695, %v538_v29 }
 0x329   :  { %v599_v33 = vmul.f32 -1.442695, %v539_v31  ;;  %v531_v34 = vpop.f32.mrb[0].mxu1 }
 0x32a   :  { %666 = vpow2.f32 %v598_v32  ;;  %v556_v36 = vadd.f32 %v536_v26, %v531_v34  ;;  %v533_v8 = vpop.f32.mrb[1].mxu1 }
 0x32b   :  { %668 = vpow2.f32 %v599_v33  ;;  %v557_v40 = vadd.f32 %v537_v27, %v533_v8 }
 0x32c   :  { %v600_v41 = vmul.f32 -1.442695, %v556_v36 }
 0x32d   :  { %v601_v42 = vmul.f32 -1.442695, %v557_v40 }
 0x32e   :  { %670 = vpow2.f32 %v600_v41 }
 0x32f   :  { %672 = vpow2.f32 %v601_v42 }
 0x334   :  { %v667_v43 = vpop.eup %666 }
 0x335   :  { %v669_v44 = vpop.eup %668  ;;  %v546_v45 = vadd.f32 1.0, %v667_v43 }
 0x336   :  { %v547_v48 = vadd.f32 1.0, %v669_v44 }
 0x337   :  { %674 = vrcp.f32 %v546_v45 }
 0x338   :  { %v671_v16 = vpop.eup %670  ;;  %676 = vrcp.f32 %v547_v48 }
 0x339   :  { %v673_v17 = vpop.eup %672  ;;  %v564_v18 = vadd.f32 1.0, %v671_v16 }
 0x33a   :  { %v565_v19 = vadd.f32 1.0, %v673_v17 }
 0x33b   :  { %678 = vrcp.f32 %v564_v18 }
 0x33c   :  { %680 = vrcp.f32 %v565_v19 }
 0x341   :  { %v675_v49 = vpop.eup %674 }
 0x342   :  { %v677_v50 = vpop.eup %676  ;;  %v552_v51 = vmul.f32 %v675_v49, %v538_v29 }
 0x343   :  { %v553_v52 = vmul.f32 %v677_v50, %v539_v31 }
 0x344   :  { %554 = vst [vmem:[#allocation11] sm:$0xff] %v552_v51 }
 0x345   :  { %v679_v53 = vpop.eup %678  ;;  %555 = vst [vmem:[#allocation11 + $0x8] sm:$0xff] %v553_v52 }
 0x346   :  { %v681_v56 = vpop.eup %680  ;;  %v570_v57 = vmul.f32 %v679_v53, %v556_v36 }
 0x347   :  { %v571_v58 = vmul.f32 %v681_v56, %v557_v40 }
 0x348   :  { %573 = vst [vmem:[#allocation11 + $0x10] sm:$0xff] %v570_v57 }
 0x349   :  { %574 = vst [vmem:[#allocation11 + $0x18] sm:$0xff] %v571_v58 }
 0x34a   :  { %803 = shalt.err (!%p800_p2)
}
 0x34b   :  { %s804_s8 = scalar_lea.hbm %s1205_s6, 512 }
 0x34c   :  { %p805_p3 = scmp.ne.s32.totalorder %s1205_s6, %s804_s8  ;;  %p808_p4 = scmp.lt.u32.totalorder %s804_s8, %s1205_s6 }
 0x34e   :  { %p810_p5 = pnand %p808_p4, %p805_p3 }
 0x350   :  { %813 = shalt.err (!%p810_p5)
}
 0x351   :  { %586 = dma.vmem_to_hbm [thread:$0]  %s581_s2, 512, %s1205_s6, [#allocation4], %s825_s4, %s825_s4, %s826_s24  }
 0x352   :  { %820 = dma.done.wait [#allocation4], 512  }
 0x353   :  { %821 = vsyncadd [#allocation4], 4294966784 }
 0x354   :  { %590 = vsyncpa [#allocation3], 1 }
 0x355   :  { %591 = vsyncpa [#allocation6], 1 }
 0x356   :  { %592 = vsyncpa [#allocation9], 1 }
 0x357   :  { %593 = vsyncpa [#allocation4], 1 }

</bundles_post_ra>
